<compile_context>
chip_gen: v7x
topology: tpu7x:2x2x1
jax: 0.10.0
libtpu: 0.0.40
codegen_flags: <defaults>
</compile_context>

<pallas_src>
import jax
import jax.numpy as jnp
from jax.experimental import pallas as pl
from jax.experimental.pallas import tpu as pltpu

LANES = 128
SUBLANES = 8
TILE_ELEMS = SUBLANES * LANES            # 1024
MAX_BLOCK_BYTES = 4 * 1024 * 1024        # per input per block (4 MiB)
VMEM_LIMIT_BYTES = 32 * 1024 * 1024      # covers 2 inputs x 2 buffers x 4 MiB + slack


def _cdiv(a: int, b: int) -> int:
    return -(-a // b)


def _num_tensorcores() -> int:
    """TensorCores per chip: 2 on v7x, 1 on v5e/v6e.  Conservative fallback: 1."""
    try:
        info = pltpu.get_tpu_info()
        for attr in ("num_cores", "num_tensorcores", "tensorcore_count", "core_count"):
            v = getattr(info, attr, None)
            if isinstance(v, int) and 1 <= v <= 8:
                return v
    except Exception:
        pass
    try:
        kind = jax.devices()[0].device_kind.lower()
        if "v7" in kind or "7x" in kind:
            return 2
    except Exception:
        pass
    return 1


def _make_tversky_kernel(block_rows: int, rows: int, steps_per_split: int,
                         total_steps: int, n_split: int):
    ragged = (rows % block_rows) != 0                       # last real block partial
    has_phantom = n_split * steps_per_split > total_steps   # blocks past the data

    def kernel(p_ref, t_ref, pt_acc_ref, s_acc_ref):
        pi = pl.program_id(0)  # split axis ("parallel")
        si = pl.program_id(1)  # reduction axis ("arbitrary")

        @pl.when(si == 0)
        def _():
            pt_acc_ref[...] = jnp.zeros_like(pt_acc_ref)
            s_acc_ref[...] = jnp.zeros_like(s_acc_ref)

        def accumulate(mask_rows: bool):
            p = p_ref[...].astype(jnp.float32)
            t = t_ref[...].astype(jnp.float32)
            if mask_rows:
                # Only compiled for the ragged last block; OOB block contents
                # are unspecified, so zero them (zeros add 0 to both sums).
                block_idx = pi * steps_per_split + si
                row0 = block_idx * block_rows
                row_ids = row0 + jax.lax.broadcasted_iota(
                    jnp.int32, (block_rows, LANES), 0
                )
                valid = row_ids < rows
                p = jnp.where(valid, p, 0.0)
                t = jnp.where(valid, t, 0.0)
            # Fold (BR, 128) -> (BR/8, 8, 128) and sum over the leading axis:
            # tile-aligned reshape + elementwise VPU adds (no per-step XLU
            # scalar reduce, no serial SMEM read-modify-write).
            pt3 = (p * t).reshape(-1, SUBLANES, LANES)
            ps3 = (p + t).reshape(-1, SUBLANES, LANES)
            pt_acc_ref[...] += jnp.sum(pt3, axis=0)[None]
            s_acc_ref[...] += jnp.sum(ps3, axis=0)[None]

        if not ragged and not has_phantom:
            # Common case: every block is full and real — no masking at all.
            accumulate(False)
        else:
            block_idx = pi * steps_per_split + si
            last_real = total_steps - 1
            full_limit = last_real if ragged else total_steps

            @pl.when(block_idx < full_limit)
            def _():
                accumulate(False)          # full blocks: mask-free fast path

            if ragged:
                @pl.when(block_idx == last_real)
                def _():
                    accumulate(True)       # only the final real block is masked
            # block_idx > last_real ("phantom" block of an uneven split):
            # contributes nothing (its DMA is clamped to the last real block).

    return kernel


def tversky_loss(predicted: jax.Array, target: jax.Array) -> jax.Array:
    """Matches TverskyLoss.forward: 1 - TP / (TP + 0.5*(FP+FN)), full reduce."""
    assert predicted.shape == target.shape

    p_flat = predicted.reshape(-1)
    t_flat = target.reshape(-1)
    n = p_flat.shape[0]

    # Kernel consumes the 1024-aligned prefix (zero-copy reshape); the
    # <=1023-element tail is folded in with plain jnp below (no padded copies).
    n_main = (n // TILE_ELEMS) * TILE_ELEMS
    tail_n = n - n_main

    if n_main == 0:
        # Tiny input: pure-JAX path (kernel launch not worth it).
        p32 = p_flat.astype(jnp.float32)
        t32 = t_flat.astype(jnp.float32)
        tp = jnp.sum(p32 * t32)
        s = jnp.sum(p32 + t32)
        return 1.0 - 2.0 * tp / s

    rows = n_main // LANES  # multiple of 8

    # Block size: up to 4 MiB per input per block, rows a multiple of 8.
    itemsize = max(p_flat.dtype.itemsize, t_flat.dtype.itemsize)
    max_rows = max(SUBLANES, (MAX_BLOCK_BYTES // (LANES * itemsize))
                   // SUBLANES * SUBLANES)
    block_rows = min(max_rows, rows)

    total_steps = _cdiv(rows, block_rows)
    # Unconditional multi-TensorCore split (2 on v7x, 1 on v5e/v6e); uneven
    # step counts are handled with phantom-block skipping inside the kernel.
    n_split = max(1, min(_num_tensorcores(), total_steps))
    steps_per_split = _cdiv(total_steps, n_split)
    has_phantom = n_split * steps_per_split > total_steps

    p2d = p_flat[:n_main].reshape(rows, LANES)
    t2d = t_flat[:n_main].reshape(rows, LANES)

    last_block = total_steps - 1
    if has_phantom:
        # Clamp phantom blocks onto the last real block so their DMA stays
        # in bounds; the kernel skips their contribution entirely.
        def in_idx(pi, si):
            return (jnp.minimum(pi * steps_per_split + si, last_block), 0)
    else:
        def in_idx(pi, si):
            return (pi * steps_per_split + si, 0)

    in_spec = pl.BlockSpec((block_rows, LANES), in_idx)
    acc_spec = pl.BlockSpec((1, SUBLANES, LANES), lambda pi, si: (pi, 0, 0))
    acc_shape = jax.ShapeDtypeStruct((n_split, SUBLANES, LANES), jnp.float32)

    pt_acc, s_acc = pl.pallas_call(
        _make_tversky_kernel(block_rows, rows, steps_per_split,
                             total_steps, n_split),
        out_shape=(acc_shape, acc_shape),
        grid_spec=pltpu.PrefetchScalarGridSpec(
            num_scalar_prefetch=0,
            grid=(n_split, steps_per_split),
            in_specs=[in_spec, in_spec],
            out_specs=[acc_spec, acc_spec],
        ),
        compiler_params=pltpu.CompilerParams(
            dimension_semantics=("parallel", "arbitrary"),
            vmem_limit_bytes=VMEM_LIMIT_BYTES,
        ),
    )(p2d, t2d)

    # Tiny epilogue: one cross-lane/sublane reduce + the loss formula.
    tp = jnp.sum(pt_acc)          # sum(p*t)
    s = jnp.sum(s_acc)            # sum(p) + sum(t)
    if tail_n:
        p_tail = p_flat[n_main:].astype(jnp.float32)
        t_tail = t_flat[n_main:].astype(jnp.float32)
        tp = tp + jnp.sum(p_tail * t_tail)
        s = s + jnp.sum(p_tail + t_tail)
    # Same NaN-on-all-zero behavior as the PyTorch module (no smoothing term).
    return 1.0 - 2.0 * tp / s


def _reference(predicted, target):
    tp = jnp.sum(predicted * target)
    fp = jnp.sum(predicted * (1.0 - target))
    fn = jnp.sum((1.0 - predicted) * target)
    return 1.0 - tp / (tp + 0.5 * (fp + fn))


if __name__ == "__main__":
    key = jax.random.PRNGKey(0)
    k1, k2, k3, k4 = jax.random.split(key, 4)

    # Small NCHW-shaped inputs (sigmoid probabilities vs. binary mask).
    shape = (2, 4, 16, 16)
    predicted = jax.nn.sigmoid(jax.random.normal(k1, shape, dtype=jnp.float32))
    target = (jax.random.uniform(k2, shape, dtype=jnp.float32) > 0.5).astype(
        jnp.float32
    )
    loss = jax.block_until_ready(tversky_loss(predicted, target))
    ref = _reference(predicted, target)
    assert jnp.allclose(loss, ref, rtol=1e-5, atol=1e-6), (loss, ref)

    # Non-1024-aligned shape exercises the jnp tail path (no padded copies).
    shape2 = (2, 3, 17, 19)
    p2 = jax.nn.sigmoid(jax.random.normal(k3, shape2, dtype=jnp.float32))
    t2 = (jax.random.uniform(k4, shape2, dtype=jnp.float32) > 0.5).astype(
        jnp.float32
    )
    loss2 = jax.block_until_ready(tversky_loss(p2, t2))
    ref2 = _reference(p2, t2)
    assert jnp.allclose(loss2, ref2, rtol=1e-5, atol=1e-6), (loss2, ref2)

    print("KERNEL_OK")
</pallas_src>

<mosaic_0001>
module attributes {stable_mosaic.version = 11 : i64} {
  func.func @kernel(%arg0: i32, %arg1: i32, %arg2: memref<16x128xf32, #tpu.memory_space<vmem>>, %arg3: memref<16x128xf32, #tpu.memory_space<vmem>>, %arg4: memref<1x8x128xf32, #tpu.memory_space<vmem>>, %arg5: memref<1x8x128xf32, #tpu.memory_space<vmem>>) attributes {dimension_semantics = [#tpu.dimension_semantics<parallel>, #tpu.dimension_semantics<arbitrary>], iteration_bounds = array<i64: 1, 1>, scalar_prefetch = 0 : i64, scratch_operands = 0 : i64, tpu.core_type = #tpu.core_type<tc>, window_params = [{transform_indices = @transform_0, window_bounds = array<i64: 16, 128>}, {transform_indices = @transform_1, window_bounds = array<i64: 16, 128>}, {transform_indices = @transform_2, window_bounds = array<i64: 1, 8, 128>}, {transform_indices = @transform_3, window_bounds = array<i64: 1, 8, 128>}]} {
    %c0_i32 = arith.constant 0 : i32
    %0 = arith.cmpi eq, %arg1, %c0_i32 : i32
    %1 = arith.extui %0 : i1 to i32
    %c0_i32_0 = arith.constant 0 : i32
    %2 = arith.cmpi ne, %1, %c0_i32_0 : i32
    scf.if %2 {
      %cst_17 = arith.constant 0.000000e+00 : f32
      %19 = vector.broadcast %cst_17 : f32 to vector<1x8x128xf32>
      %c0_18 = arith.constant 0 : index
      %c0_19 = arith.constant 0 : index
      %c0_20 = arith.constant 0 : index
      %20 = vector.load %arg4[%c0_18, %c0_19, %c0_20] : memref<1x8x128xf32, #tpu.memory_space<vmem>>, vector<1x8x128xf32>
      tpu.vector_store %arg4[%c0_18, %c0_19, %c0_20], %19 {strides = array<i32>} : memref<1x8x128xf32, #tpu.memory_space<vmem>>, vector<1x8x128xf32>,
      %cst_21 = arith.constant 0.000000e+00 : f32
      %21 = vector.broadcast %cst_21 : f32 to vector<1x8x128xf32>
      %c0_22 = arith.constant 0 : index
      %c0_23 = arith.constant 0 : index
      %c0_24 = arith.constant 0 : index
      %22 = vector.load %arg5[%c0_22, %c0_23, %c0_24] : memref<1x8x128xf32, #tpu.memory_space<vmem>>, vector<1x8x128xf32>
      tpu.vector_store %arg5[%c0_22, %c0_23, %c0_24], %21 {strides = array<i32>} : memref<1x8x128xf32, #tpu.memory_space<vmem>>, vector<1x8x128xf32>,
    } else {
    }
    %c0 = arith.constant 0 : index
    %c0_1 = arith.constant 0 : index
    %3 = vector.load %arg2[%c0, %c0_1] : memref<16x128xf32, #tpu.memory_space<vmem>>, vector<16x128xf32>
    %c0_2 = arith.constant 0 : index
    %c0_3 = arith.constant 0 : index
    %4 = vector.load %arg3[%c0_2, %c0_3] : memref<16x128xf32, #tpu.memory_space<vmem>>, vector<16x128xf32>
    %5 = arith.mulf %3, %4 : vector<16x128xf32>
    %6 = vector.shape_cast %5 : vector<16x128xf32> to vector<2x8x128xf32>
    %7 = arith.addf %3, %4 : vector<16x128xf32>
    %8 = vector.shape_cast %7 : vector<16x128xf32> to vector<2x8x128xf32>
    %c0_4 = arith.constant 0 : index
    %c0_5 = arith.constant 0 : index
    %c0_6 = arith.constant 0 : index
    %9 = vector.load %arg4[%c0_4, %c0_5, %c0_6] : memref<1x8x128xf32, #tpu.memory_space<vmem>>, vector<1x8x128xf32>
    %cst = arith.constant dense<0.000000e+00> : vector<8x128xf32>
    %10 = vector.multi_reduction <add>, %6, %cst [0] : vector<2x8x128xf32> to vector<8x128xf32>
    %11 = vector.shape_cast %10 : vector<8x128xf32> to vector<1x8x128xf32>
    %12 = arith.addf %9, %11 : vector<1x8x128xf32>
    %c0_7 = arith.constant 0 : index
    %c0_8 = arith.constant 0 : index
    %c0_9 = arith.constant 0 : index
    %13 = vector.load %arg4[%c0_7, %c0_8, %c0_9] : memref<1x8x128xf32, #tpu.memory_space<vmem>>, vector<1x8x128xf32>
    tpu.vector_store %arg4[%c0_7, %c0_8, %c0_9], %12 {strides = array<i32>} : memref<1x8x128xf32, #tpu.memory_space<vmem>>, vector<1x8x128xf32>,
    %c0_10 = arith.constant 0 : index
    %c0_11 = arith.constant 0 : index
    %c0_12 = arith.constant 0 : index
    %14 = vector.load %arg5[%c0_10, %c0_11, %c0_12] : memref<1x8x128xf32, #tpu.memory_space<vmem>>, vector<1x8x128xf32>
    %cst_13 = arith.constant dense<0.000000e+00> : vector<8x128xf32>
    %15 = vector.multi_reduction <add>, %8, %cst_13 [0] : vector<2x8x128xf32> to vector<8x128xf32>
    %16 = vector.shape_cast %15 : vector<8x128xf32> to vector<1x8x128xf32>
    %17 = arith.addf %14, %16 : vector<1x8x128xf32>
    %c0_14 = arith.constant 0 : index
    %c0_15 = arith.constant 0 : index
    %c0_16 = arith.constant 0 : index
    %18 = vector.load %arg5[%c0_14, %c0_15, %c0_16] : memref<1x8x128xf32, #tpu.memory_space<vmem>>, vector<1x8x128xf32>
    tpu.vector_store %arg5[%c0_14, %c0_15, %c0_16], %17 {strides = array<i32>} : memref<1x8x128xf32, #tpu.memory_space<vmem>>, vector<1x8x128xf32>,
    return
  }
  func.func @transform_0(%arg0: i32, %arg1: i32) -> (i32, i32) {
    %c1_i32 = arith.constant 1 : i32
    %0 = arith.muli %arg0, %c1_i32 : i32
    %1 = arith.addi %0, %arg1 : i32
    %c0_i32 = arith.constant 0 : i32
    %c0_i32_0 = arith.constant 0 : i32
    return %1, %c0_i32 : i32, i32
  }
  func.func @transform_1(%arg0: i32, %arg1: i32) -> (i32, i32) {
    %c1_i32 = arith.constant 1 : i32
    %0 = arith.muli %arg0, %c1_i32 : i32
    %1 = arith.addi %0, %arg1 : i32
    %c0_i32 = arith.constant 0 : i32
    %c0_i32_0 = arith.constant 0 : i32
    return %1, %c0_i32 : i32, i32
  }
  func.func @transform_2(%arg0: i32, %arg1: i32) -> (i32, i32, i32) {
    %c0_i32 = arith.constant 0 : i32
    %c0_i32_0 = arith.constant 0 : i32
    %c0_i32_1 = arith.constant 0 : i32
    return %arg0, %c0_i32, %c0_i32_0 : i32, i32, i32
  }
  func.func @transform_3(%arg0: i32, %arg1: i32) -> (i32, i32, i32) {
    %c0_i32 = arith.constant 0 : i32
    %c0_i32_0 = arith.constant 0 : i32
    %c0_i32_1 = arith.constant 0 : i32
    return %arg0, %c0_i32, %c0_i32_0 : i32, i32, i32
  }
}

</mosaic_0001>

<bundles_post_ra>
// kernel: tpu_custom_call.1
= control target key start
LH: loop header
LB: loop body
LE: loop exit
PB: predicated region body
PF: predicated region fallthrough
CT: control target
= control target key end

     0   :  { %9 = vsyncpa [#allocation3], 0  ;;  %s284_s0 = inlined_call_operand.hbm [shape: f32[16,128], index: 0, kind: input, shape index: {}]   ;;  %s285_s1 = inlined_call_operand.hbm [shape: f32[16,128], index: 1, kind: input, shape index: {}]   ;;  %s286_s2 = inlined_call_operand.hbm [shape: f32[1,8,128], index: 2, kind: output, shape index: {0}]   ;;  %s287_s3 = inlined_call_operand.hbm [shape: f32[1,8,128], index: 3, kind: output, shape index: {1}]  }
   0x1   :  { %10 = vsyncpa [#allocation6], 0 }
   0x2   :  { %11 = vsyncpa [#allocation4], 0 }
   0x3   :  { %12 = vsyncpa [#allocation9], 0  ;;  %s210_s12 = smov [#allocation2]   ;;  %s114_s16 = scalar_lea.hbm %s284_s0, 256 }
   0x4   :  { %s22_s13 = sshll.u32 %s210_s12, 4  ;;  %p115_p0 = scmp.ne.s32.totalorder %s284_s0, %s114_s16  ;;  %s23_s13 = int_to_ptr.vmem [resolvable:$true] %s22_s13 }
   0x5   :  { %p118_p1 = scmp.lt.u32.totalorder %s114_s16, %s284_s0 }
   0x7   :  { %p120_p2 = pnand %p118_p1, %p115_p0 }
   0x9   :  { %123 = shalt.err (!%p120_p2)
}
   0xa   :  { %s124_s21 = scalar_lea.vmem %s23_s13, 256  ;;  %p129_p4 = scmp.lt.s32.totalorder %s23_s13, %s23_s13 }
   0xb   :  { %p125_p3 = scmp.ne.s32.totalorder %s23_s13, %s124_s21  ;;  %p130_p5 = scmp.lt.s32.totalorder %s124_s21, %s124_s21 }
   0xd   :  { %p131_p6 = por %p130_p5, %p129_p4 }
   0xf   :  { %p132_p7 = pnand %p131_p6, %p125_p3 }
  0x11   :  { %135 = shalt.err (!%p132_p7)
}
  0x12   :  { %s211_s22 = smov 128   ;;  %s212_s23 = smov 8  }
  0x13   :  { %28 = dma.hbm_to_vmem [thread:$0]  %s284_s0, 256, %s23_s13, [#allocation3], %s211_s22, %s211_s22, %s212_s23  }
  0x14   :  { %s213_s26 = smov [#allocation5]   ;;  %s136_s30 = scalar_lea.hbm %s285_s1, 256 }
  0x15   :  { %s38_s27 = sshll.u32 %s213_s26, 4  ;;  %p137_p8 = scmp.ne.s32.totalorder %s285_s1, %s136_s30  ;;  %s39_s27 = int_to_ptr.vmem [resolvable:$true] %s38_s27 }
  0x16   :  { %p140_p9 = scmp.lt.u32.totalorder %s136_s30, %s285_s1 }
  0x18   :  { %p142_p10 = pnand %p140_p9, %p137_p8 }
  0x1a   :  { %145 = shalt.err (!%p142_p10)
}
  0x1b   :  { %s146_s8 = scalar_lea.vmem %s39_s27, 256  ;;  %p151_p12 = scmp.lt.s32.totalorder %s39_s27, %s39_s27 }
  0x1c   :  { %p147_p11 = scmp.ne.s32.totalorder %s39_s27, %s146_s8  ;;  %p152_p13 = scmp.lt.s32.totalorder %s146_s8, %s146_s8 }
  0x1e   :  { %p153_p0 = por %p152_p13, %p151_p12 }
  0x20   :  { %p154_p1 = pnand %p153_p0, %p147_p11 }
  0x22   :  { %157 = shalt.err (!%p154_p1)
}
  0x23   :  { %44 = dma.hbm_to_vmem [thread:$0]  %s285_s1, 256, %s39_s27, [#allocation6], %s211_s22, %s211_s22, %s212_s23  }
  0x24   :  { %202 = dma.done.wait [#allocation3], 256  }
  0x25   :  { %203 = vsyncadd [#allocation3], 4294967040 }
  0x26   :  { %204 = dma.done.wait [#allocation6], 256  }
  0x27   :  { %205 = vsyncadd [#allocation6], 4294967040  ;;  %v61_v0 = vld [vmem:[#allocation2] sm:$0xff]  ;;  %v62_v1 = vld [vmem:[#allocation2 + $0x8] sm:$0xff]  ;;  %s214_s10 = smov [#allocation7]   ;;  %s215_s12 = smov [#allocation8]  }
  0x28   :  { %v63_v2 = vld [vmem:[#allocation5] sm:$0xff]  ;;  %v64_v3 = vld [vmem:[#allocation5 + $0x8] sm:$0xff]  ;;  %s83_s11 = sshll.u32 %s214_s10, 4  ;;  %s93_s13 = sshll.u32 %s215_s12, 4  ;;  %s84_s11 = int_to_ptr.vmem [resolvable:$true] %s83_s11  ;;  %s94_s13 = int_to_ptr.vmem [resolvable:$true] %s93_s13 }
  0x29   :  { %v65_v4 = vmul.f32 %v63_v2, %v61_v0  ;;  %v67_v5 = vadd.f32 %v63_v2, %v61_v0  ;;  %v66_v6 = vmul.f32 %v64_v3, %v62_v1  ;;  %v68_v7 = vadd.f32 %v64_v3, %v62_v1  ;;  %s158_s1 = scalar_lea.vmem %s84_s11, 128  ;;  %p163_p3 = scmp.lt.s32.totalorder %s84_s11, %s84_s11 }
  0x2a   :  { %p159_p2 = scmp.ne.s32.totalorder %s84_s11, %s158_s1  ;;  %p164_p4 = scmp.lt.s32.totalorder %s158_s1, %s158_s1 }
  0x2b   :  { %v70_v8 = vadd.f32 %v66_v6, %v65_v4  ;;  %v74_v9 = vadd.f32 %v68_v7, %v67_v5 }
  0x2c   :  { %p165_p5 = por %p164_p4, %p163_p3 }
  0x2d   :  { %72 = vst [vmem:[#allocation7] sm:$0xff] %v70_v8  ;;  %76 = vst [vmem:[#allocation8] sm:$0xff] %v74_v9 }
  0x2e   :  { %p166_p6 = pnand %p165_p5, %p159_p2 }
  0x30   :  { %169 = shalt.err (!%p166_p6)
}
  0x31   :  { %s170_s16 = scalar_lea.hbm %s286_s2, 128 }
  0x32   :  { %p171_p7 = scmp.ne.s32.totalorder %s286_s2, %s170_s16  ;;  %p174_p8 = scmp.lt.u32.totalorder %s170_s16, %s286_s2 }
  0x34   :  { %p176_p9 = pnand %p174_p8, %p171_p7 }
  0x36   :  { %179 = shalt.err (!%p176_p9)
}
  0x37   :  { %86 = dma.vmem_to_hbm [thread:$0]  %s84_s11, 128, %s286_s2, [#allocation4]  }
  0x38   :  { %s180_s23 = scalar_lea.vmem %s94_s13, 128  ;;  %p185_p11 = scmp.lt.s32.totalorder %s94_s13, %s94_s13 }
  0x39   :  { %p181_p10 = scmp.ne.s32.totalorder %s94_s13, %s180_s23  ;;  %p186_p12 = scmp.lt.s32.totalorder %s180_s23, %s180_s23 }
  0x3b   :  { %p187_p13 = por %p186_p12, %p185_p11 }
  0x3d   :  { %p188_p0 = pnand %p187_p13, %p181_p10 }
  0x3f   :  { %191 = shalt.err (!%p188_p0)
}
  0x40   :  { %s192_s26 = scalar_lea.hbm %s287_s3, 128 }
  0x41   :  { %p193_p1 = scmp.ne.s32.totalorder %s287_s3, %s192_s26  ;;  %p196_p2 = scmp.lt.u32.totalorder %s192_s26, %s287_s3 }
  0x43   :  { %p198_p3 = pnand %p196_p2, %p193_p1 }
  0x45   :  { %201 = shalt.err (!%p198_p3)
}
  0x46   :  { %96 = dma.vmem_to_hbm [thread:$0]  %s94_s13, 128, %s287_s3, [#allocation9]  }
  0x47   :  { %206 = dma.done.wait [#allocation4], 128  }
  0x48   :  { %207 = vsyncadd [#allocation4], 4294967168 }
  0x49   :  { %208 = dma.done.wait [#allocation9], 128  }
  0x4a   :  { %209 = vsyncadd [#allocation9], 4294967168 }
  0x4b   :  { %103 = vsyncpa [#allocation3], 1 }
  0x4c   :  { %104 = vsyncpa [#allocation6], 1 }
  0x4d   :  { %105 = vsyncpa [#allocation4], 1 }
  0x4e   :  { %106 = vsyncpa [#allocation9], 1 }

</bundles_post_ra>
